<compile_context>
chip_gen: v7x
topology: tpu7x:2x2x1
jax: 0.10.0
libtpu: 0.0.40
codegen_flags: <defaults>
</compile_context>

<pallas_src>
import jax
import jax.numpy as jnp
from jax.experimental import pallas as pl
from jax.experimental.pallas import tpu as pltpu


def _rnn_seq_kernel(x_ref, s0_ref, w1_ref, w2_ref, b12_ref, w3_ref, b3_ref,
                    out_ref, state_out_ref, state_scr):
    t = pl.program_id(0)

    # Load the initial hidden state into the resident VMEM accumulator.
    @pl.when(t == 0)
    def _():
        state_scr[...] = s0_ref[...]

    x = x_ref[0]                                           # [B_pad, input_size]
    # state_{t} = ReLU(fc1(x_t) + fc2(state_{t-1}))   (biases pre-fused)
    h = (jnp.dot(x, w1_ref[...], preferred_element_type=jnp.float32)
         + jnp.dot(state_scr[...], w2_ref[...], preferred_element_type=jnp.float32)
         + b12_ref[...])
    new_state = jnp.maximum(h, 0.0)
    state_scr[...] = new_state

    # output_t = fc3(state_t)   (classifier padded to 128 lanes -> dense store)
    out_ref[0] = (jnp.dot(new_state, w3_ref[...], preferred_element_type=jnp.float32)
                  + b3_ref[...]).astype(out_ref.dtype)

    # Write the final hidden state back once, on the last step.
    @pl.when(t == pl.num_programs(0) - 1)
    def _():
        state_out_ref[...] = new_state.astype(state_out_ref.dtype)


@jax.jit
def rnn_sequence_forward(x_seq, state0, params):
    """Run the rnn_single recurrence over a whole sequence in one kernel.

    x_seq:  [T, B, input_size]   (T = instances in the MIL bag)
    state0: [B, ndims]
    returns (outputs [T, B, 2], final_state [B, ndims])
    """
    w1, b1, w2, b2, w3, b3 = params
    T, B, K = x_seq.shape
    ndims = w1.shape[1]
    n_out = w3.shape[1]

    B_pad = ((B + 7) // 8) * 8        # sublane-dense batch
    N_pad = 128                       # lane-dense classifier output

    if B_pad != B:
        x_seq = jnp.pad(x_seq, ((0, 0), (0, B_pad - B), (0, 0)))
        state0 = jnp.pad(state0, ((0, B_pad - B), (0, 0)))

    b12 = (b1 + b2).reshape(1, ndims).astype(jnp.float32)
    w3_p = jnp.pad(w3, ((0, 0), (0, N_pad - n_out)))
    b3_p = jnp.pad(b3.reshape(1, n_out), ((0, 0), (0, N_pad - n_out)))

    grid_spec = pltpu.PrefetchScalarGridSpec(
        num_scalar_prefetch=0,
        grid=(T,),
        in_specs=[
            pl.BlockSpec((1, B_pad, K), lambda t: (t, 0, 0)),   # x_t streams per step
            pl.BlockSpec((B_pad, ndims), lambda t: (0, 0)),     # state0 (resident)
            pl.BlockSpec((K, ndims), lambda t: (0, 0)),         # w1 (resident)
            pl.BlockSpec((ndims, ndims), lambda t: (0, 0)),     # w2 (resident)
            pl.BlockSpec((1, ndims), lambda t: (0, 0)),         # b1 + b2 (resident)
            pl.BlockSpec((ndims, N_pad), lambda t: (0, 0)),     # w3 padded (resident)
            pl.BlockSpec((1, N_pad), lambda t: (0, 0)),         # b3 padded (resident)
        ],
        out_specs=(
            pl.BlockSpec((1, B_pad, N_pad), lambda t: (t, 0, 0)),  # per-step logits
            pl.BlockSpec((B_pad, ndims), lambda t: (0, 0)),        # final state
        ),
        scratch_shapes=[pltpu.VMEM((B_pad, ndims), jnp.float32)],  # state carry
    )

    out_seq, final_state = pl.pallas_call(
        _rnn_seq_kernel,
        grid_spec=grid_spec,
        out_shape=(
            jax.ShapeDtypeStruct((T, B_pad, N_pad), jnp.float32),
            jax.ShapeDtypeStruct((B_pad, ndims), jnp.float32),
        ),
        input_output_aliases={1: 1},   # state buffer updated in place
        compiler_params=pltpu.CompilerParams(
            dimension_semantics=("arbitrary",)),   # sequential recurrence
    )(x_seq, state0, w1, w2, b12, w3_p, b3_p)

    return out_seq[:, :B, :n_out], final_state[:B]


def rnn_single_forward(x, state, params):
    """Single-step API matching the PyTorch forward(input, state)."""
    out_seq, new_state = rnn_sequence_forward(x[None], state, params)
    return out_seq[0], new_state


def init_params(key, input_size, ndims, n_classes=2):
    """Deterministic init mimicking nn.Linear default (uniform +/- 1/sqrt(fan_in))."""
    ks = jax.random.split(key, 6)

    def linear(kw, kb, fan_in, fan_out):
        bound = 1.0 / jnp.sqrt(fan_in)
        w = jax.random.uniform(kw, (fan_in, fan_out), jnp.float32, -bound, bound)
        b = jax.random.uniform(kb, (1, fan_out), jnp.float32, -bound, bound)
        return w, b

    w1, b1 = linear(ks[0], ks[1], input_size, ndims)
    w2, b2 = linear(ks[2], ks[3], ndims, ndims)
    w3, b3 = linear(ks[4], ks[5], ndims, n_classes)
    return (w1, b1, w2, b2, w3, b3)


def reference_forward_step(x, state, params):
    """Pure-JAX reference matching one PyTorch forward step."""
    w1, b1, w2, b2, w3, b3 = params
    h_in = x @ w1 + b1
    h_st = state @ w2 + b2
    new_state = jnp.maximum(h_st + h_in, 0.0)
    out = new_state @ w3 + b3
    return out, new_state


def reference_sequence(x_seq, state0, params):
    outs = []
    state = state0
    for t in range(x_seq.shape[0]):
        o, state = reference_forward_step(x_seq[t], state, params)
        outs.append(o)
    return jnp.stack(outs, 0), state


if __name__ == "__main__":
    # Module-consistent small shapes: resnet18/34 feature size 512, ndims=32,
    # a bag of T=8 instances, batch(bag)-size 4.
    T = 8
    batch = 4
    input_size = 512
    ndims = 32

    key = jax.random.PRNGKey(0)
    k_params, k_x = jax.random.split(key)

    params = init_params(k_params, input_size, ndims)
    x_seq = jax.random.normal(k_x, (T, batch, input_size), jnp.float32)
    state0 = jnp.zeros((batch, ndims), jnp.float32)   # init_hidden(batch_size)

    out_seq, final_state = rnn_sequence_forward(x_seq, state0, params)
    out_seq = jax.block_until_ready(out_seq)
    final_state = jax.block_until_ready(final_state)

    out_ref, state_ref = reference_sequence(x_seq, state0, params)
    assert out_seq.shape == (T, batch, 2)
    assert final_state.shape == (batch, ndims)
    assert jnp.allclose(out_seq, out_ref, atol=1e-4, rtol=1e-4)
    assert jnp.allclose(final_state, state_ref, atol=1e-4, rtol=1e-4)

    # Single-step API parity with the original PyTorch forward(input, state).
    out1, state1 = rnn_single_forward(x_seq[0], state0, params)
    out1_ref, state1_ref = reference_forward_step(x_seq[0], state0, params)
    assert jnp.allclose(out1, out1_ref, atol=1e-4, rtol=1e-4)
    assert jnp.allclose(state1, state1_ref, atol=1e-4, rtol=1e-4)

    print("KERNEL_OK")
</pallas_src>

<mosaic_0001>
module attributes {stable_mosaic.version = 11 : i64} {
  func.func @_rnn_seq_kernel(%arg0: i32, %arg1: memref<1x8x512xf32, #tpu.memory_space<vmem>>, %arg2: memref<8x32xf32, #tpu.memory_space<vmem>>, %arg3: memref<512x32xf32, #tpu.memory_space<vmem>>, %arg4: memref<32x32xf32, #tpu.memory_space<vmem>>, %arg5: memref<1x32xf32, #tpu.memory_space<vmem>>, %arg6: memref<32x128xf32, #tpu.memory_space<vmem>>, %arg7: memref<1x128xf32, #tpu.memory_space<vmem>>, %arg8: memref<1x8x128xf32, #tpu.memory_space<vmem>>, %arg9: memref<8x32xf32, #tpu.memory_space<vmem>>, %arg10: memref<8x32xf32, #tpu.memory_space<vmem>>) attributes {dimension_semantics = [#tpu.dimension_semantics<arbitrary>], iteration_bounds = array<i64: 8>, scalar_prefetch = 0 : i64, scratch_operands = 1 : i64, tpu.core_type = #tpu.core_type<tc>, window_params = [{transform_indices = @transform_0, window_bounds = array<i64: 1, 8, 512>}, {pipeline_mode = #tpu.pipeline_mode<synchronous>, transform_indices = @transform_1, window_bounds = array<i64: 8, 32>}, {pipeline_mode = #tpu.pipeline_mode<synchronous>, transform_indices = @transform_2, window_bounds = array<i64: 512, 32>}, {pipeline_mode = #tpu.pipeline_mode<synchronous>, transform_indices = @transform_3, window_bounds = array<i64: 32, 32>}, {pipeline_mode = #tpu.pipeline_mode<synchronous>, transform_indices = @transform_4, window_bounds = array<i64: 1, 32>}, {pipeline_mode = #tpu.pipeline_mode<synchronous>, transform_indices = @transform_5, window_bounds = array<i64: 32, 128>}, {pipeline_mode = #tpu.pipeline_mode<synchronous>, transform_indices = @transform_6, window_bounds = array<i64: 1, 128>}, {transform_indices = @transform_7, window_bounds = array<i64: 1, 8, 128>}, {pipeline_mode = #tpu.pipeline_mode<synchronous>, transform_indices = @transform_8, window_bounds = array<i64: 8, 32>}]} {
    %c0_i32 = arith.constant 0 : i32
    %0 = arith.cmpi eq, %arg0, %c0_i32 : i32
    %1 = arith.extui %0 : i1 to i32
    %c0_i32_0 = arith.constant 0 : i32
    %2 = arith.cmpi ne, %1, %c0_i32_0 : i32
    scf.if %2 {
      %c0_24 = arith.constant 0 : index
      %c0_25 = arith.constant 0 : index
      %28 = vector.load %arg2[%c0_24, %c0_25] : memref<8x32xf32, #tpu.memory_space<vmem>>, vector<8x32xf32>
      %c0_26 = arith.constant 0 : index
      %c0_27 = arith.constant 0 : index
      %29 = vector.load %arg10[%c0_26, %c0_27] : memref<8x32xf32, #tpu.memory_space<vmem>>, vector<8x32xf32>
      tpu.vector_store %arg10[%c0_26, %c0_27], %28 {strides = array<i32>} : memref<8x32xf32, #tpu.memory_space<vmem>>, vector<8x32xf32>,
    } else {
    }
    %c0 = arith.constant 0 : index
    %c0_1 = arith.constant 0 : index
    %c0_2 = arith.constant 0 : index
    %3 = vector.load %arg1[%c0, %c0_1, %c0_2] : memref<1x8x512xf32, #tpu.memory_space<vmem>>, vector<1x8x512xf32>
    %4 = vector.shape_cast %3 : vector<1x8x512xf32> to vector<8x512xf32>
    %c0_3 = arith.constant 0 : index
    %c0_4 = arith.constant 0 : index
    %5 = vector.load %arg3[%c0_3, %c0_4] : memref<512x32xf32, #tpu.memory_space<vmem>>, vector<512x32xf32>
    %cst = arith.constant dense<0.000000e+00> : vector<8x32xf32>
    %6 = tpu.matmul %4, %5, %cst {dimension_numbers = #tpu.dot_dimension_numbers<[1], [0], [0], [1], [0, 0, 1, 1], [], []>} : vector<8x512xf32>, vector<512x32xf32>, vector<8x32xf32> -> vector<8x32xf32>
    %c0_5 = arith.constant 0 : index
    %c0_6 = arith.constant 0 : index
    %7 = vector.load %arg10[%c0_5, %c0_6] : memref<8x32xf32, #tpu.memory_space<vmem>>, vector<8x32xf32>
    %c0_7 = arith.constant 0 : index
    %c0_8 = arith.constant 0 : index
    %8 = vector.load %arg4[%c0_7, %c0_8] : memref<32x32xf32, #tpu.memory_space<vmem>>, vector<32x32xf32>
    %cst_9 = arith.constant dense<0.000000e+00> : vector<8x32xf32>
    %9 = tpu.matmul %7, %8, %cst_9 {dimension_numbers = #tpu.dot_dimension_numbers<[1], [0], [0], [1], [0, 0, 1, 1], [], []>} : vector<8x32xf32>, vector<32x32xf32>, vector<8x32xf32> -> vector<8x32xf32>
    %10 = arith.addf %6, %9 : vector<8x32xf32>
    %c0_10 = arith.constant 0 : index
    %c0_11 = arith.constant 0 : index
    %11 = vector.load %arg5[%c0_10, %c0_11] : memref<1x32xf32, #tpu.memory_space<vmem>>, vector<1x32xf32>
    %12 = vector.broadcast %11 : vector<1x32xf32> to vector<8x32xf32>
    %13 = arith.addf %10, %12 : vector<8x32xf32>
    %cst_12 = arith.constant 0.000000e+00 : f32
    %14 = vector.broadcast %cst_12 : f32 to vector<8x32xf32>
    %15 = arith.maximumf %13, %14 : vector<8x32xf32>
    %c0_13 = arith.constant 0 : index
    %c0_14 = arith.constant 0 : index
    %16 = vector.load %arg10[%c0_13, %c0_14] : memref<8x32xf32, #tpu.memory_space<vmem>>, vector<8x32xf32>
    tpu.vector_store %arg10[%c0_13, %c0_14], %15 {strides = array<i32>} : memref<8x32xf32, #tpu.memory_space<vmem>>, vector<8x32xf32>,
    %c0_15 = arith.constant 0 : index
    %c0_16 = arith.constant 0 : index
    %17 = vector.load %arg6[%c0_15, %c0_16] : memref<32x128xf32, #tpu.memory_space<vmem>>, vector<32x128xf32>
    %cst_17 = arith.constant dense<0.000000e+00> : vector<8x128xf32>
    %18 = tpu.matmul %15, %17, %cst_17 {dimension_numbers = #tpu.dot_dimension_numbers<[1], [0], [0], [1], [0, 0, 1, 1], [], []>} : vector<8x32xf32>, vector<32x128xf32>, vector<8x128xf32> -> vector<8x128xf32>
    %c0_18 = arith.constant 0 : index
    %c0_19 = arith.constant 0 : index
    %19 = vector.load %arg7[%c0_18, %c0_19] : memref<1x128xf32, #tpu.memory_space<vmem>>, vector<1x128xf32>
    %20 = vector.broadcast %19 : vector<1x128xf32> to vector<8x128xf32>
    %21 = arith.addf %18, %20 : vector<8x128xf32>
    %c0_20 = arith.constant 0 : index
    %c0_21 = arith.constant 0 : index
    %c0_22 = arith.constant 0 : index
    %22 = vector.load %arg8[%c0_20, %c0_21, %c0_22] : memref<1x8x128xf32, #tpu.memory_space<vmem>>, vector<1x8x128xf32>
    %23 = vector.shape_cast %22 : vector<1x8x128xf32> to vector<8x128xf32>
    %24 = vector.shape_cast %21 : vector<8x128xf32> to vector<1x8x128xf32>
    tpu.vector_store %arg8[%c0_20, %c0_21, %c0_22], %24 {strides = array<i32>} : memref<1x8x128xf32, #tpu.memory_space<vmem>>, vector<1x8x128xf32>,
    %c7_i32 = arith.constant 7 : i32
    %25 = arith.cmpi eq, %arg0, %c7_i32 : i32
    %26 = arith.extui %25 : i1 to i32
    %c0_i32_23 = arith.constant 0 : i32
    %27 = arith.cmpi ne, %26, %c0_i32_23 : i32
    scf.if %27 {
      %c0_24 = arith.constant 0 : index
      %c0_25 = arith.constant 0 : index
      %28 = vector.load %arg9[%c0_24, %c0_25] : memref<8x32xf32, #tpu.memory_space<vmem>>, vector<8x32xf32>
      tpu.vector_store %arg9[%c0_24, %c0_25], %15 {strides = array<i32>} : memref<8x32xf32, #tpu.memory_space<vmem>>, vector<8x32xf32>,
    } else {
    }
    return
  }
  func.func @transform_0(%arg0: i32) -> (i32, i32, i32) {
    %c0_i32 = arith.constant 0 : i32
    %c0_i32_0 = arith.constant 0 : i32
    %c0_i32_1 = arith.constant 0 : i32
    return %arg0, %c0_i32, %c0_i32_0 : i32, i32, i32
  }
  func.func @transform_1(%arg0: i32) -> (i32, i32) {
    %c0_i32 = arith.constant 0 : i32
    %c0_i32_0 = arith.constant 0 : i32
    %c0_i32_1 = arith.constant 0 : i32
    return %c0_i32, %c0_i32_0 : i32, i32
  }
  func.func @transform_2(%arg0: i32) -> (i32, i32) {
    %c0_i32 = arith.constant 0 : i32
    %c0_i32_0 = arith.constant 0 : i32
    %c0_i32_1 = arith.constant 0 : i32
    return %c0_i32, %c0_i32_0 : i32, i32
  }
  func.func @transform_3(%arg0: i32) -> (i32, i32) {
    %c0_i32 = arith.constant 0 : i32
    %c0_i32_0 = arith.constant 0 : i32
    %c0_i32_1 = arith.constant 0 : i32
    return %c0_i32, %c0_i32_0 : i32, i32
  }
  func.func @transform_4(%arg0: i32) -> (i32, i32) {
    %c0_i32 = arith.constant 0 : i32
    %c0_i32_0 = arith.constant 0 : i32
    %c0_i32_1 = arith.constant 0 : i32
    return %c0_i32, %c0_i32_0 : i32, i32
  }
  func.func @transform_5(%arg0: i32) -> (i32, i32) {
    %c0_i32 = arith.constant 0 : i32
    %c0_i32_0 = arith.constant 0 : i32
    %c0_i32_1 = arith.constant 0 : i32
    return %c0_i32, %c0_i32_0 : i32, i32
  }
  func.func @transform_6(%arg0: i32) -> (i32, i32) {
    %c0_i32 = arith.constant 0 : i32
    %c0_i32_0 = arith.constant 0 : i32
    %c0_i32_1 = arith.constant 0 : i32
    return %c0_i32, %c0_i32_0 : i32, i32
  }
  func.func @transform_7(%arg0: i32) -> (i32, i32, i32) {
    %c0_i32 = arith.constant 0 : i32
    %c0_i32_0 = arith.constant 0 : i32
    %c0_i32_1 = arith.constant 0 : i32
    return %arg0, %c0_i32, %c0_i32_0 : i32, i32, i32
  }
  func.func @transform_8(%arg0: i32) -> (i32, i32) {
    %c0_i32 = arith.constant 0 : i32
    %c0_i32_0 = arith.constant 0 : i32
    %c0_i32_1 = arith.constant 0 : i32
    return %c0_i32, %c0_i32_0 : i32, i32
  }
}

</mosaic_0001>

<bundles_post_ra>
// kernel: rnn_sequence_forward.1
= control target key start
LH: loop header
LB: loop body
LE: loop exit
PB: predicated region body
PF: predicated region fallthrough
CT: control target
= control target key end

     0   :  { %s1017_s27 = smov 0   ;;  %s1289_s0 = inlined_call_operand.vmem [shape: f32[8,8,512], index: 0, kind: input, shape index: {}]   ;;  %s1290_s1 = inlined_call_operand.vmem [shape: f32[8,32], index: 1, kind: input, shape index: {}, may-alias: {1,8}]   ;;  %s1291_s2 = inlined_call_operand.vmem [shape: f32[512,32], index: 2, kind: input, shape index: {}]   ;;  %s1292_s3 = inlined_call_operand.vmem [shape: f32[32,32], index: 3, kind: input, shape index: {}]   ;;  %s1293_s4 = inlined_call_operand.vmem [shape: f32[1,32], index: 4, kind: input, shape index: {}]   ;;  %s1294_s5 = inlined_call_operand.vmem [shape: f32[32,128], index: 5, kind: input, shape index: {}]   ;;  %s1295_s6 = inlined_call_operand.vmem [shape: f32[1,128], index: 6, kind: input, shape index: {}]   ;;  %s1296_s7 = inlined_call_operand.vmem [shape: f32[8,8,128], index: 7, kind: output, shape index: {0}]   ;;  %s1297_s8 = inlined_call_operand.vmem [shape: f32[8,32], index: 8, kind: output, shape index: {1}, may-alias: {1,8}]  }
   0x1 LB: > { %s1023_s28 = sadd.s32 4294967295, %s967_s27   ;;  %p759_p0 = scmp.ge.s32.totalorder %s967_s27, 1  ;;  %s967_s27 = sphi %s1017_s27, %s19_s27  }
   0x2   : > { %p260_p1 = scmp.lt.s32.totalorder %s967_s27, 9 }
   0x4   : > { %p261_p2 = pnand %p759_p0, %p260_p1 }
   0x5   : > { %p293_p3 = scmp.lt.s32.totalorder (!%p261_p2), %s1023_s28, 7  ;;  %p763_p4 = scmp.ne.s32.totalorder (!%p261_p2), %s1023_s28, 0 }
   0x6   : > { %264 = sbr.rel (%p261_p2) target bundleno = 499 (0x1f3), region = 48 }
   0xd   : > { %s294_s29 = scalar_select %p293_p3, %s1023_s28, 7 }
   0xe   : > { %305 = sbr.rel (%p763_p4) target bundleno = 21 (0x15), region = 52  ;;  %v306_v0 = vld [vmem:[%s1290_s1] sm:$0xff] (!%p763_p4)  ;;  %vm307_vm0 = vcmask (!%p763_p4), 261120  }
   0xf   : > { %s771_s30 = sshll.u32 %s294_s29, 5  ;;  %s762_s9 = sshll.u32 %s294_s29, 3  ;;  %308 = vst.msk [vmem:[#allocation2] sm:$0xff] (!%p763_p4), %vm307_vm0, %v306_v0 }
  0x10   : > { %s1032_s12 = scalar_lea.vmem %s1289_s0, %s771_s30  ;;  %s1037_s15 = scalar_lea.vmem %s1296_s7, %s762_s9 }
  0x15 PF: > { %v378_v1 = vld [vmem:[%s1292_s3] sm:$0xff]  ;;  %v379_v2 = vld [vmem:[%s1292_s3 + $0x8] sm:$0xff]  ;;  %v969_v4 = vmov 0.0|0.0   ;;  %vm970_vm1 = vmmov 0   ;;  %v971_v9 = vmov 0.0   ;;  %v380_v12 = vld [vmem:[%s1292_s3 + $0x10] sm:$0xff] }
  0x16   : > { %v329_v3 = vld [vmem:[%s1291_s2 + $0x80] sm:$0xff]  ;;  %874 = vmatprep.subr.bf16.mxu0 %v969_v4  ;;  %v875_v5 = vpack.c.bf16 %v379_v2, %v378_v1  ;;  %v330_v6 = vld [vmem:[%s1291_s2 + $0x88] sm:$0xff]  ;;  %860 = vmatprep.mubr.msk.f32.mxu0 %vm970_vm1, %v971_v9  ;;  %v381_v13 = vld [vmem:[%s1292_s3 + $0x18] sm:$0xff]  ;;  %vm382_vm2 = vcmask 261120   ;;  %p768_p5 = scmp.ne.s32.totalorder %s1023_s28, 7 }
  0x17   : > { %v313_v7 = vld [vmem:[%s1291_s2] sm:$0xff]  ;;  %v314_v8 = vld [vmem:[%s1291_s2 + $0x8] sm:$0xff]  ;;  %v880_v10 = vpack.c.bf16 %v330_v6, %v329_v3  ;;  %v331_v14 = vld [vmem:[%s1291_s2 + $0x90] sm:$0xff]  ;;  %v878_v15 = vpack.c.bf16 %v381_v13, %v380_v12 }
  0x18   : > { %v882_v11 = vpack.c.bf16 %v314_v8, %v313_v7  ;;  %876 = vmatpush3.bf16.msra.mxu0 %v875_v5  ;;  %v332_v16 = vld [vmem:[%s1291_s2 + $0x98] sm:$0xff]  ;;  %v315_v17 = vld [vmem:[%s1291_s2 + $0x10] sm:$0xff]  ;;  %v361_v20 = vld [vmem:[%s1291_s2 + $0x180] sm:$0xff] }
  0x19   : > { %v316_v18 = vld [vmem:[%s1291_s2 + $0x18] sm:$0xff]  ;;  %881 = vmatprep.subr.bf16.mxu1 %v880_v10  ;;  %877 = vmatprep.subr.bf16.mxu0 %v969_v4  ;;  %v884_v19 = vpack.c.bf16 %v332_v16, %v331_v14  ;;  %v362_v21 = vld [vmem:[%s1291_s2 + $0x188] sm:$0xff]  ;;  %v377_v23 = vld [vmem:[#allocation2] sm:$0xff] }
  0x1a   : > { %883 = vmatpush3.bf16.msra.mxu1 %v882_v11  ;;  %v886_v22 = vpack.c.bf16 %v316_v18, %v315_v17  ;;  %v912_v24 = vpack.c.bf16 %v362_v21, %v361_v20  ;;  %v333_v25 = vld [vmem:[%s1291_s2 + $0xa0] sm:$0xff]  ;;  %v334_v26 = vld [vmem:[%s1291_s2 + $0xa8] sm:$0xff]  ;;  %v363_v33 = vld [vmem:[%s1291_s2 + $0x190] sm:$0xff] }
  0x1b   : > { %v345_v27 = vld [vmem:[%s1291_s2 + $0x100] sm:$0xff]  ;;  %885 = vmatprep.subr.bf16.mxu1 %v884_v19  ;;  %v888_v28 = vpack.c.bf16 %v334_v26, %v333_v25  ;;  %v346_v29 = vld [vmem:[%s1291_s2 + $0x108] sm:$0xff]  ;;  %v364_v34 = vld [vmem:[%s1291_s2 + $0x198] sm:$0xff] }
  0x1c   : > { %v317_v30 = vld [vmem:[%s1291_s2 + $0x20] sm:$0xff]  ;;  %v318_v31 = vld [vmem:[%s1291_s2 + $0x28] sm:$0xff]  ;;  %879 = vmatpush3.bf16.msra.mxu0 %v878_v15  ;;  %v914_v32 = vpack.c.bf16 %v346_v29, %v345_v27  ;;  %v335_v35 = vld [vmem:[%s1291_s2 + $0xb0] sm:$0xff]  ;;  %v916_v36 = vpack.c.bf16 %v364_v34, %v363_v33 }
  0x1d   : > { %913 = vmatprep.subr.bf16.mxu0 %v912_v24  ;;  %v336_v37 = vld [vmem:[%s1291_s2 + $0xb8] sm:$0xff]  ;;  %v347_v38 = vld [vmem:[%s1291_s2 + $0x110] sm:$0xff]  ;;  %v890_v40 = vpack.c.bf16 %v318_v31, %v317_v30  ;;  %v365_v41 = vld [vmem:[%s1291_s2 + $0x1a0] sm:$0xff] }
  0x1e   : > { %v348_v39 = vld [vmem:[%s1291_s2 + $0x118] sm:$0xff]  ;;  %887 = vmatpush3.bf16.msra.mxu1 %v886_v22  ;;  %v892_v42 = vpack.c.bf16 %v336_v37, %v335_v35  ;;  %v319_v43 = vld [vmem:[%s1291_s2 + $0x30] sm:$0xff]  ;;  %v366_v45 = vld [vmem:[%s1291_s2 + $0x1a8] sm:$0xff] }
  0x1f   : > { %861 = vmatmul.mubr.msk.f32.vlgmr.msra.gmra.mrb[0].mxu0 %vm382_vm2, %v377_v23  ;;  %889 = vmatprep.subr.bf16.mxu1 %v888_v28  ;;  %v320_v44 = vld [vmem:[%s1291_s2 + $0x38] sm:$0xff]  ;;  %v918_v46 = vpack.c.bf16 %v348_v39, %v347_v38  ;;  %v337_v47 = vld [vmem:[%s1291_s2 + $0xc0] sm:$0xff]  ;;  %v338_v48 = vld [vmem:[%s1291_s2 + $0xc8] sm:$0xff]  ;;  %v920_v49 = vpack.c.bf16 %v366_v45, %v365_v41 }
  0x20   : > { %915 = vmatpush3.bf16.msra.mxu0 %v914_v32  ;;  %v349_v50 = vld [vmem:[%s1291_s2 + $0x120] sm:$0xff]  ;;  %v350_v51 = vld [vmem:[%s1291_s2 + $0x128] sm:$0xff]  ;;  %v894_v52 = vpack.c.bf16 %v320_v44, %v319_v43  ;;  %v367_v53 = vld [vmem:[%s1291_s2 + $0x1b0] sm:$0xff]  ;;  %v896_v55 = vpack.c.bf16 %v338_v48, %v337_v47 }
  0x21   : > { %917 = vmatprep.subr.bf16.mxu0 %v916_v36  ;;  %v368_v54 = vld [vmem:[%s1291_s2 + $0x1b8] sm:$0xff]  ;;  %v321_v56 = vld [vmem:[%s1291_s2 + $0x40] sm:$0xff]  ;;  %v322_v57 = vld [vmem:[%s1291_s2 + $0x48] sm:$0xff]  ;;  %v922_v58 = vpack.c.bf16 %v350_v51, %v349_v50 }
  0x22   : > { %891 = vmatpush3.bf16.msra.mxu1 %v890_v40  ;;  %v339_v59 = vld [vmem:[%s1291_s2 + $0xd0] sm:$0xff]  ;;  %v340_v60 = vld [vmem:[%s1291_s2 + $0xd8] sm:$0xff]  ;;  %v924_v61 = vpack.c.bf16 %v368_v54, %v367_v53  ;;  %v898_v0 = vpack.c.bf16 %v322_v57, %v321_v56  ;;  %v369_v1 = vld [vmem:[%s1291_s2 + $0x1c0] sm:$0xff] }
  0x23   : > { %893 = vmatprep.subr.bf16.mxu1 %v892_v42  ;;  %v351_v62 = vld [vmem:[%s1291_s2 + $0x130] sm:$0xff]  ;;  %v352_v63 = vld [vmem:[%s1291_s2 + $0x138] sm:$0xff]  ;;  %v370_v2 = vld [vmem:[%s1291_s2 + $0x1c8] sm:$0xff]  ;;  %v900_v3 = vpack.c.bf16 %v340_v60, %v339_v59 }
  0x24   : > { %919 = vmatpush3.bf16.msra.mxu0 %v918_v46  ;;  %v323_v5 = vld [vmem:[%s1291_s2 + $0x50] sm:$0xff]  ;;  %v324_v6 = vld [vmem:[%s1291_s2 + $0x58] sm:$0xff]  ;;  %v926_v7 = vpack.c.bf16 %v352_v63, %v351_v62  ;;  %v341_v8 = vld [vmem:[%s1291_s2 + $0xe0] sm:$0xff]  ;;  %v928_v11 = vpack.c.bf16 %v370_v2, %v369_v1 }
  0x25   : > { %921 = vmatprep.subr.bf16.mxu0 %v920_v49  ;;  %v342_v10 = vld [vmem:[%s1291_s2 + $0xe8] sm:$0xff]  ;;  %v353_v12 = vld [vmem:[%s1291_s2 + $0x140] sm:$0xff]  ;;  %v902_v15 = vpack.c.bf16 %v324_v6, %v323_v5  ;;  %v371_v16 = vld [vmem:[%s1291_s2 + $0x1d0] sm:$0xff] }
  0x26   : > { %895 = vmatpush3.bf16.msra.mxu1 %v894_v52  ;;  %v354_v13 = vld [vmem:[%s1291_s2 + $0x148] sm:$0xff]  ;;  %v372_v17 = vld [vmem:[%s1291_s2 + $0x1d8] sm:$0xff]  ;;  %v904_v18 = vpack.c.bf16 %v342_v10, %v341_v8  ;;  %v325_v19 = vld [vmem:[%s1291_s2 + $0x60] sm:$0xff] }
  0x27   : > { %897 = vmatprep.subr.bf16.mxu1 %v896_v55  ;;  %v310_v14 = vld [vmem:[%s1032_s12 + $0x8] sm:$0xff]  ;;  %v930_v21 = vpack.c.bf16 %v354_v13, %v353_v12  ;;  %v343_v22 = vld [vmem:[%s1291_s2 + $0xf0] sm:$0xff]  ;;  %v344_v23 = vld [vmem:[%s1291_s2 + $0xf8] sm:$0xff]  ;;  %v932_v25 = vpack.c.bf16 %v372_v17, %v371_v16 }
  0x28   : > { %923 = vmatpush3.bf16.msra.mxu0 %v922_v58  ;;  %520 = vmatprep.mubr.f32.mxu1 %v310_v14  ;;  %v326_v20 = vld [vmem:[%s1291_s2 + $0x68] sm:$0xff]  ;;  %v312_v24 = vld [vmem:[%s1032_s12 + $0x18] sm:$0xff]  ;;  %v355_v26 = vld [vmem:[%s1291_s2 + $0x150] sm:$0xff]  ;;  %v908_v31 = vpack.c.bf16 %v344_v23, %v343_v22 }
  0x29   : > { %925 = vmatprep.subr.bf16.mxu0 %v924_v61  ;;  %v356_v27 = vld [vmem:[%s1291_s2 + $0x158] sm:$0xff]  ;;  %590 = vmatprep.mubr.f32.mxu0 %v312_v24  ;;  %v906_v28 = vpack.c.bf16 %v326_v20, %v325_v19  ;;  %v373_v29 = vld [vmem:[%s1291_s2 + $0x1e0] sm:$0xff]  ;;  %v374_v30 = vld [vmem:[%s1291_s2 + $0x1e8] sm:$0xff] }
  0x2a   : > { %899 = vmatpush3.bf16.msra.mxu1 %v898_v0  ;;  %v327_v32 = vld [vmem:[%s1291_s2 + $0x70] sm:$0xff]  ;;  %v328_v33 = vld [vmem:[%s1291_s2 + $0x78] sm:$0xff]  ;;  %v934_v34 = vpack.c.bf16 %v356_v27, %v355_v26  ;;  %v936_v35 = vpack.c.bf16 %v374_v30, %v373_v29  ;;  %v357_v36 = vld [vmem:[%s1291_s2 + $0x160] sm:$0xff] }
  0x2b   : > { %901 = vmatprep.subr.bf16.mxu1 %v900_v3  ;;  %v358_v37 = vld [vmem:[%s1291_s2 + $0x168] sm:$0xff]  ;;  %v910_v38 = vpack.c.bf16 %v328_v33, %v327_v32  ;;  %v375_v39 = vld [vmem:[%s1291_s2 + $0x1f0] sm:$0xff]  ;;  %v376_v40 = vld [vmem:[%s1291_s2 + $0x1f8] sm:$0xff] }
  0x2c   : > { %927 = vmatpush3.bf16.msra.mxu0 %v926_v7  ;;  %v938_v41 = vpack.c.bf16 %v358_v37, %v357_v36  ;;  %v940_v42 = vpack.c.bf16 %v376_v40, %v375_v39  ;;  %v359_v43 = vld [vmem:[%s1291_s2 + $0x170] sm:$0xff]  ;;  %v360_v44 = vld [vmem:[%s1291_s2 + $0x178] sm:$0xff]  ;;  %v309_v45 = vld [vmem:[%s1032_s12] sm:$0xff] }
  0x2d   : > { %929 = vmatprep.subr.bf16.mxu0 %v928_v11  ;;  %v942_v46 = vpack.c.bf16 %v360_v44, %v359_v43  ;;  %v311_v47 = vld [vmem:[%s1032_s12 + $0x10] sm:$0xff]  ;;  %v606_v48 = vld [vmem:[%s1294_s5] sm:$0xff]  ;;  %v607_v49 = vld [vmem:[%s1294_s5 + $0x8] sm:$0xff] }
  0x2e   : > { %903 = vmatpush3.bf16.msra.mxu1 %v902_v15  ;;  %v945_v50 = vpack.c.bf16 %v607_v49, %v606_v48  ;;  %v608_v51 = vld [vmem:[%s1294_s5 + $0x10] sm:$0xff]  ;;  %v765_v61 = vld [vmem:[%s1293_s4] ss:$0 sm:$0xff] }
  0x2f   : > { %905 = vmatprep.subr.bf16.mxu1 %v904_v18  ;;  %v766_v1 = vld [vmem:[%s1295_s6] ss:$0 sm:$0xff] }
  0x30   : > { %931 = vmatpush3.bf16.msra.mxu0 %v930_v21 }
  0x31   : > { %933 = vmatprep.subr.bf16.mxu0 %v932_v25 }
  0x32   : > { %907 = vmatpush3.bf16.msra.mxu1 %v906_v28 }
  0x33   : > { %909 = vmatprep.subr.bf16.mxu1 %v908_v31 }
  0x34   : > { %935 = vmatpush3.bf16.msra.mxu0 %v934_v34 }
  0x35   : > { %937 = vmatprep.subr.bf16.mxu0 %v936_v35 }
  0x36   : > { %911 = vmatpush3.bf16.msra.mxu1 %v910_v38 }
  0x37   : > { %944 = vmatprep.subr.bf16.mxu1 %v969_v4 }
  0x38   : > { %939 = vmatpush3.bf16.msra.mxu0 %v938_v41 }
  0x39   : > { %521 = vmatmul.mubr.f32.vlgmr.msra.gmra.mrb[0].mxu1 %v309_v45  ;;  %941 = vmatprep.subr.bf16.mxu0 %v940_v42 }
  0x3a   : > { %871 = vmatprep.mubr.msk.f32.mxu1 %vm970_vm1, %v971_v9  ;;  %946 = vmatpush3.bf16.msra.mxu1 %v945_v50  ;;  %v609_v9 = vld [vmem:[%s1294_s5 + $0x18] sm:$0xff] }
  0x3b   : > { %947 = vmatprep.subr.bf16.mxu1 %v969_v4  ;;  %v948_v52 = vpack.c.bf16 %v609_v9, %v608_v51 }
  0x3c   : > { %943 = vmatpush3.bf16.msra.mxu0 %v942_v46 }
  0x3e   : > { %949 = vmatpush3.bf16.msra.mxu1 %v948_v52 }
  0x3f   : > { %591 = vmatmul.mubr.f32.vlgmr.msra.gmra.mrb[2].mxu0 %v311_v47 }
  0xf2   : > { %v452_v53 = vpop.f32.mrb[0].mxu0 }
  0xf3   : > { %v862_v54 = vpop.f32.mrb[1].mxu0 }
 0x10c   : > { %v809_v55 = vpop.f32.mrb[0].mxu1 }
 0x10d   : > { %v810_v56 = vpop.f32.mrb[1].mxu1 }
 0x10e   : > { %v811_v57 = vadd.f32 %v810_v56, %v809_v55 }
 0x110   : > { %v523_v58 = vadd.f32 %v811_v57, %v452_v53 }
 0x112   : > { %v844_v59 = vpop.f32.mrb[2].mxu0 }
 0x113   : > { %v845_v60 = vpop.f32.mrb[3].mxu0 }
 0x114   : > { %v846_v4 = vadd.f32 %v845_v60, %v844_v59 }
 0x116   : > { %v593_v62 = vadd.f32 %v846_v4, %v523_v58 }
 0x118   : > { %v603_v63 = vadd.f32 %v765_v61, %v593_v62 }
 0x11a   : > { %v604_v0 = vmax.f32 %v603_v63, 0.0 }
 0x11c   : > { %605 = vst.msk [vmem:[#allocation2] sm:$0xff] %vm382_vm2, %v604_v0  ;;  %872 = vmatmul.mubr.msk.f32.vlgmr.msra.gmra.mrb[2].mxu1 %vm382_vm2, %v604_v0  ;;  %695 = vst.msk [vmem:[%s1297_s8] sm:$0xff] (!%p768_p5), %vm382_vm2, %v604_v0 }
 0x1ec   : > { %694 = sbr.rel (%p768_p5) target bundleno = 499 (0x1f3), region = 56 }
 0x1ef   : > { %v686_v2 = vpop.f32.mrb[2].mxu1 }
 0x1f0   : > { %v687_v3 = vadd.f32 %v766_v1, %v686_v2  ;;  %v873_v5 = vpop.f32.mrb[3].mxu1 }
 0x1f2   : > { %690 = vst [vmem:[%s1037_s15] sm:$0xff] %v687_v3 }
 0x1f3 PF: > { %s19_s27 = sadd.s32 1, %s967_s27  }
 0x1f4   : > { %p16_p6 = scmp.ge.s32.totalorder %s19_s27, 10  }
 0x1f6   :  { %18 = sbr.rel (!%p16_p6) target bundleno = 1 (0x1), region = 94 }

</bundles_post_ra>
